<compile_context>
chip_gen: v7x
topology: tpu7x:2x2x1
jax: 0.10.0
libtpu: 0.0.40
codegen_flags: <defaults>
</compile_context>

<pallas_src>
import functools

import jax
import jax.numpy as jnp
from jax.experimental import pallas as pl
from jax.experimental.pallas import tpu as pltpu

LANES = 128
SUBLANES = 8


def _round_up(x, m):
    return ((x + m - 1) // m) * m


def _choose_tile(rows, tile_rows):
    """Row-tile that is a multiple of 8 (or the full array when rows <= 8),
    capped so the grid keeps >= 2 steps (v7x megacore) when possible."""
    if rows <= SUBLANES:
        return rows                                    # single full-array block
    tile_rows = max(SUBLANES, (tile_rows // SUBLANES) * SUBLANES)
    half = _round_up(-(-rows // 2), SUBLANES)          # ~rows/2 -> grid >= 2
    return max(SUBLANES, min(tile_rows, half))


def _vmem_limit_bytes():
    # ~3/4 of this chip's VMEM (v5e/v6e: 64 MiB cap, v7x: ~48 MiB); far above
    # the double-buffered working set of an 8192-row tile (16 MiB).
    try:
        cap = int(pltpu.get_tpu_info().vmem_capacity_bytes)
    except Exception:
        cap = 64 * 1024 * 1024
    return min(cap * 3 // 4, 64 * 1024 * 1024)


def ltu_kernel(z_ref, w_ref, ua_ref, ub_ref, b_ref, o_ref):
    # z_ref : (TILE_R, 128) f32, flat view of (N, 2): even lane = z[:,0],
    #         odd lane = z[:,1] of the same row.
    # w_ref : (1, 128) = [w0, w1, w0, w1, ...]
    # ua_ref: (1, 128) = [u0, 0,  u0, 0,  ...]
    # ub_ref: (1, 128) = [u1, 0,  u1, 0,  ...]
    # b_ref : (1,) bias scalar in SMEM.
    z = z_ref[...]
    wv = w_ref[...]
    ua = ua_ref[...]
    ub = ub_ref[...]
    bias = b_ref[0]

    lanes = z.shape[-1]
    # Pairwise dot product z . w (valid at even lanes after the roll-add).
    t = z * wv
    s = t + pltpu.roll(t, lanes - 1, 1) + bias      # s[2i] = z0*w0 + z1*w1 + b
    h = jnp.tanh(s)                                 # EUP; valid at even lanes

    # out[2i]   = z[2i]   + h[2i]*u0
    # out[2i+1] = z[2i+1] + h[2i]*u1
    # (odd-lane garbage in h is zeroed by ub before the roll, so no select.)
    out = z + h * ua + pltpu.roll(h * ub, 1, 1)
    o_ref[...] = out.astype(o_ref.dtype)


@functools.partial(jax.jit, static_argnames=("tile_rows",))
def ltu_forward(z, w, b, u, *, tile_rows=8192):
    """z: (N, 2); w: (1, 2); b: (1,); u: (1, 2). out = z + tanh(z@w.T + b) @ u."""
    orig_dtype = z.dtype
    if z.dtype != jnp.float32:
        # TODO(synk): bf16 would need 16-row min tiles and looser tolerances.
        z = z.astype(jnp.float32)
    n, d = z.shape
    assert d == 2
    total = n * d

    aligned = (total % LANES) == 0
    if aligned:
        # Zero-copy path: contiguous row-major reshape, no pad, no tail slice.
        ptotal = total
        zf = z.reshape(-1)
    else:
        # Rare fallback (2*N not a multiple of 128): one pad + one tail slice.
        ptotal = _round_up(total, SUBLANES * LANES)
        zf = jnp.pad(z.reshape(-1), (0, ptotal - total))
    rows = ptotal // LANES
    z2 = zf.reshape(rows, LANES)

    tile_r = _choose_tile(rows, tile_rows)
    grid = (pl.cdiv(rows, tile_r),)

    # Lane-replicated parameter vectors: built once (128 elems, negligible),
    # resident in VMEM across the whole grid (constant block index).
    lane = jnp.arange(LANES)
    even = (lane & 1) == 0
    f32 = jnp.float32
    w_vec = jnp.where(even, w[0, 0], w[0, 1]).astype(f32).reshape(1, LANES)
    u_a = jnp.where(even, u[0, 0], 0.0).astype(f32).reshape(1, LANES)
    u_b = jnp.where(even, u[0, 1], 0.0).astype(f32).reshape(1, LANES)
    b_arr = b.reshape(1).astype(f32)

    out2 = pl.pallas_call(
        ltu_kernel,
        out_shape=jax.ShapeDtypeStruct((rows, LANES), f32),
        grid_spec=pltpu.PrefetchScalarGridSpec(
            num_scalar_prefetch=0,
            grid=grid,
            in_specs=[
                pl.BlockSpec((tile_r, LANES), lambda i: (i, 0)),
                pl.BlockSpec((1, LANES), lambda i: (0, 0)),
                pl.BlockSpec((1, LANES), lambda i: (0, 0)),
                pl.BlockSpec((1, LANES), lambda i: (0, 0)),
                pl.BlockSpec(memory_space=pltpu.MemorySpace.SMEM),
            ],
            out_specs=pl.BlockSpec((tile_r, LANES), lambda i: (i, 0)),
        ),
        compiler_params=pltpu.CompilerParams(
            dimension_semantics=("parallel",),
            vmem_limit_bytes=_vmem_limit_bytes(),
        ),
        cost_estimate=pl.CostEstimate(
            flops=8 * total,
            transcendentals=total // 2,
            bytes_accessed=2 * total * 4,
        ),
    )(z2, w_vec, u_a, u_b, b_arr)

    if aligned:
        out = out2.reshape(n, d)
    else:
        out = out2.reshape(-1)[:total].reshape(n, d)
    return out.astype(orig_dtype)


def init_params(key):
    """Deterministic parameter init mirroring the PyTorch __init__."""
    kw, kb, ku = jax.random.split(key, 3)
    w = 0.1 * jax.random.normal(kw, (1, 2), dtype=jnp.float32)
    b = 0.1 * jax.random.normal(kb, (1,), dtype=jnp.float32)
    u = 0.1 * jax.random.normal(ku, (1, 2), dtype=jnp.float32)

    # get_u_hat(): enforce u^T w >= -1 (only applied if violated, as in torch)
    wtu = jnp.sum(u * w)

    def fix_u(u):
        m_wtu = -1.0 + jnp.log1p(jnp.exp(wtu))
        return u + (m_wtu - wtu) * w / (jnp.linalg.norm(w) ** 2)

    u = jax.lax.cond(wtu < -1.0, fix_u, lambda u: u, u)
    return w, b, u


def ltu_reference(z, w, b, u):
    x = z @ w.T
    x = x + b
    x = jnp.tanh(x)
    x = x @ u
    return z + x


if __name__ == "__main__":
    key = jax.random.PRNGKey(0)
    kp, kz1, kz2, kz3, kz4 = jax.random.split(key, 5)
    w, b, u = init_params(kp)

    # Case 1: tiny batch -> padded fallback path, single block.
    z1 = jax.random.normal(kz1, (8, 2), dtype=jnp.float32)
    out1 = jax.block_until_ready(ltu_forward(z1, w, b, u))
    ref1 = ltu_reference(z1, w, b, u)
    assert out1.shape == (8, 2)
    assert jnp.allclose(out1, ref1, atol=1e-5, rtol=1e-5), "mismatch (n=8)"

    # Case 2: lane-aligned batch (2*N % 128 == 0) -> zero-copy path with a
    # forced multi-step grid and a ragged last block (rows=37, tile=8).
    z2 = jax.random.normal(kz2, (2368, 2), dtype=jnp.float32)
    out2 = jax.block_until_ready(ltu_forward(z2, w, b, u, tile_rows=8))
    ref2 = ltu_reference(z2, w, b, u)
    assert out2.shape == (2368, 2)
    assert jnp.allclose(out2, ref2, atol=1e-5, rtol=1e-5), "mismatch (n=2368)"

    # Case 3: non-aligned batch -> padded path, 2-step grid, default tiles.
    z3 = jax.random.normal(kz3, (1000, 2), dtype=jnp.float32)
    out3 = jax.block_until_ready(ltu_forward(z3, w, b, u))
    ref3 = ltu_reference(z3, w, b, u)
    assert out3.shape == (1000, 2)
    assert jnp.allclose(out3, ref3, atol=1e-5, rtol=1e-5), "mismatch (n=1000)"

    # Case 4: larger aligned batch -> zero-copy path, default tile selection
    # (rows=1024 -> 512-row blocks, 2 grid steps).
    z4 = jax.random.normal(kz4, (65536, 2), dtype=jnp.float32)
    out4 = jax.block_until_ready(ltu_forward(z4, w, b, u))
    ref4 = ltu_reference(z4, w, b, u)
    assert out4.shape == (65536, 2)
    assert jnp.allclose(out4, ref4, atol=1e-5, rtol=1e-5), "mismatch (n=65536)"

    print("KERNEL_OK")
</pallas_src>

<mosaic_0001>
module attributes {stable_mosaic.version = 11 : i64} {
  func.func @ltu_kernel(%arg0: i32, %arg1: memref<8x128xf32, #tpu.memory_space<vmem>>, %arg2: memref<1x128xf32, #tpu.memory_space<vmem>>, %arg3: memref<1x128xf32, #tpu.memory_space<vmem>>, %arg4: memref<1x128xf32, #tpu.memory_space<vmem>>, %arg5: memref<1xf32, #tpu.memory_space<smem>>, %arg6: memref<8x128xf32, #tpu.memory_space<vmem>>) attributes {dimension_semantics = [#tpu.dimension_semantics<parallel>], iteration_bounds = array<i64: 1>, scalar_prefetch = 0 : i64, scratch_operands = 0 : i64, tpu.core_type = #tpu.core_type<tc>, window_params = [{transform_indices = @transform_0, window_bounds = array<i64: 8, 128>}, {pipeline_mode = #tpu.pipeline_mode<synchronous>, transform_indices = @transform_1, window_bounds = array<i64: 1, 128>}, {pipeline_mode = #tpu.pipeline_mode<synchronous>, transform_indices = @transform_2, window_bounds = array<i64: 1, 128>}, {pipeline_mode = #tpu.pipeline_mode<synchronous>, transform_indices = @transform_3, window_bounds = array<i64: 1, 128>}, {transform_indices = @transform_4, window_bounds = array<i64: 1>}, {transform_indices = @transform_5, window_bounds = array<i64: 8, 128>}]} {
    %c0 = arith.constant 0 : index
    %c0_0 = arith.constant 0 : index
    %0 = vector.load %arg1[%c0, %c0_0] : memref<8x128xf32, #tpu.memory_space<vmem>>, vector<8x128xf32>
    %c0_1 = arith.constant 0 : index
    %c0_2 = arith.constant 0 : index
    %1 = vector.load %arg2[%c0_1, %c0_2] : memref<1x128xf32, #tpu.memory_space<vmem>>, vector<1x128xf32>
    %c0_3 = arith.constant 0 : index
    %c0_4 = arith.constant 0 : index
    %2 = vector.load %arg3[%c0_3, %c0_4] : memref<1x128xf32, #tpu.memory_space<vmem>>, vector<1x128xf32>
    %c0_5 = arith.constant 0 : index
    %c0_6 = arith.constant 0 : index
    %3 = vector.load %arg4[%c0_5, %c0_6] : memref<1x128xf32, #tpu.memory_space<vmem>>, vector<1x128xf32>
    %c0_7 = arith.constant 0 : index
    %4 = memref.load %arg5[%c0_7] : memref<1xf32, #tpu.memory_space<smem>>
    %5 = vector.broadcast %1 : vector<1x128xf32> to vector<8x128xf32>
    %6 = arith.mulf %0, %5 : vector<8x128xf32>
    %c127_i32 = arith.constant 127 : i32
    %7 = tpu.dynamic_rotate %6 by %c127_i32 dim 1 : vector<8x128xf32>, i32 -> vector<8x128xf32>
    %8 = arith.addf %6, %7 : vector<8x128xf32>
    %9 = vector.broadcast %4 : f32 to vector<8x128xf32>
    %10 = arith.addf %8, %9 : vector<8x128xf32>
    %11 = math.tanh %10 : vector<8x128xf32>
    %12 = vector.broadcast %2 : vector<1x128xf32> to vector<8x128xf32>
    %13 = arith.mulf %11, %12 : vector<8x128xf32>
    %14 = arith.addf %0, %13 : vector<8x128xf32>
    %15 = vector.broadcast %3 : vector<1x128xf32> to vector<8x128xf32>
    %16 = arith.mulf %11, %15 : vector<8x128xf32>
    %c1_i32 = arith.constant 1 : i32
    %17 = tpu.dynamic_rotate %16 by %c1_i32 dim 1 : vector<8x128xf32>, i32 -> vector<8x128xf32>
    %18 = arith.addf %14, %17 : vector<8x128xf32>
    %c0_8 = arith.constant 0 : index
    %c0_9 = arith.constant 0 : index
    %19 = vector.load %arg6[%c0_8, %c0_9] : memref<8x128xf32, #tpu.memory_space<vmem>>, vector<8x128xf32>
    tpu.vector_store %arg6[%c0_8, %c0_9], %18 {strides = array<i32>} : memref<8x128xf32, #tpu.memory_space<vmem>>, vector<8x128xf32>,
    return
  }
  func.func @transform_0(%arg0: i32) -> (i32, i32) {
    %c0_i32 = arith.constant 0 : i32
    %c0_i32_0 = arith.constant 0 : i32
    return %arg0, %c0_i32 : i32, i32
  }
  func.func @transform_1(%arg0: i32) -> (i32, i32) {
    %c0_i32 = arith.constant 0 : i32
    %c0_i32_0 = arith.constant 0 : i32
    %c0_i32_1 = arith.constant 0 : i32
    return %c0_i32, %c0_i32_0 : i32, i32
  }
  func.func @transform_2(%arg0: i32) -> (i32, i32) {
    %c0_i32 = arith.constant 0 : i32
    %c0_i32_0 = arith.constant 0 : i32
    %c0_i32_1 = arith.constant 0 : i32
    return %c0_i32, %c0_i32_0 : i32, i32
  }
  func.func @transform_3(%arg0: i32) -> (i32, i32) {
    %c0_i32 = arith.constant 0 : i32
    %c0_i32_0 = arith.constant 0 : i32
    %c0_i32_1 = arith.constant 0 : i32
    return %c0_i32, %c0_i32_0 : i32, i32
  }
  func.func @transform_4(%arg0: i32) -> i32 {
    %c0_i32 = arith.constant 0 : i32
    %c0_i32_0 = arith.constant 0 : i32
    return %c0_i32 : i32
  }
  func.func @transform_5(%arg0: i32) -> (i32, i32) {
    %c0_i32 = arith.constant 0 : i32
    %c0_i32_0 = arith.constant 0 : i32
    return %arg0, %c0_i32 : i32, i32
  }
}

</mosaic_0001>

<bundles_post_ra>
// kernel: ltu_forward.1
= control target key start
LH: loop header
LB: loop body
LE: loop exit
PB: predicated region body
PF: predicated region fallthrough
CT: control target
= control target key end

     0   :  { %s69_s22 = smov 127   ;;  %s119_s0 = inlined_call_operand.vmem [shape: f32[8,128], index: 0, kind: input, shape index: {}]   ;;  %s120_s1 = inlined_call_operand.vmem [shape: f32[1,128], index: 1, kind: input, shape index: {}]   ;;  %s121_s4 = inlined_call_operand.<no memory space> [shape: f32[1], index: 4, kind: input, shape index: {}]   ;;  %s122_s3 = inlined_call_operand.vmem [shape: f32[1,128], index: 3, kind: input, shape index: {}]   ;;  %s123_s2 = inlined_call_operand.vmem [shape: f32[1,128], index: 2, kind: input, shape index: {}]   ;;  %s124_s5 = inlined_call_operand.vmem [shape: f32[8,128], index: 5, kind: output, shape index: {}]  }
   0x1   :  { %v21_v0 = vld [vmem:[%s119_s0] sm:$0xff]  ;;  %v36_v3 = vstv %s121_s4  ;;  %s70_s0 = smov 1  }
   0x2   :  { %v62_v1 = vld [vmem:[%s120_s1] ss:$0 sm:$0xff] }
   0x3   :  { %v32_v2 = vmul.f32 %v62_v1, %v21_v0  ;;  %v64_v7 = vld [vmem:[%s122_s3] ss:$0 sm:$0xff] }
   0x4   :  { %v63_v10 = vld [vmem:[%s123_s2] ss:$0 sm:$0xff] }
   0x5   :  { %33 = vrot.lane.b32.xlu0 %v32_v2, %s69_s22 }
  0x77   :  { %v34_v4 = vpop.permute.xlu0 %33 }
  0x78   :  { %v35_v5 = vadd.f32 %v34_v4, %v32_v2 }
  0x7a   :  { %v37_v6 = vadd.f32 %v36_v3, %v35_v5 }
  0x7c   :  { %67 = vtanh.f32 %v37_v6 }
  0x86   :  { %v68_v8 = vpop.eup %67 }
  0x87   :  { %v53_v9 = vmul.f32 %v68_v8, %v64_v7  ;;  %v45_v11 = vmul.f32 %v68_v8, %v63_v10 }
  0x89   :  { %54 = vrot.lane.b32.xlu0 %v53_v9, %s70_s0  ;;  %v46_v12 = vadd.f32 %v45_v11, %v21_v0 }
  0xfb   :  { %v55_v13 = vpop.permute.xlu0 %54 }
  0xfc   :  { %v56_v14 = vadd.f32 %v55_v13, %v46_v12 }
  0xfe   :  { %57 = vst [vmem:[%s124_s5] sm:$0xff] %v56_v14 }

</bundles_post_ra>
